<compile_context>
chip_gen: v7x
topology: tpu7x:2x2x1
jax: 0.10.0
libtpu: 0.0.40
codegen_flags: <defaults>
</compile_context>

<pallas_src>
import jax
import jax.numpy as jnp
from jax.experimental import pallas as pl
from jax.experimental.pallas import tpu as pltpu

P = 128   # lane width: every activation/weight tile is lane-dense (., 128)
A_OFF = 64  # lane offset of the action sub-network inside the 128-lane tile

# Slot layout of the stacked (5, P, P) matmul weights / (5, 1, P) biases.
W_L2, W_L3, W_P1, W_P2, W_P3 = 0, 1, 2, 3, 4


def fmodel_kernel(s_ref, a_ref, w1_ref, b1_ref, w_ref, b_ref, o_ref):
    """Fully fused Fmodel forward for one tile of `tm` batch rows.

    s_ref/a_ref: (tm, 2) native-width state/action inputs.
    w1_ref:      (4, P)  first-layer weights, rows = [s_in0, s_in1, a_in0, a_in1].
    b1_ref:      (1, P)  first-layer bias (state lanes 0:16, action lanes 64:80).
    w_ref:       (5, P, P) block-diagonally packed weights for layers 2..5.
    b_ref:       (5, 1, P) matching biases.
    o_ref:       (tm, 2) final prediction tile.
    """
    s = s_ref[...]                      # (tm, 2)
    a = a_ref[...]                      # (tm, 2)

    # Layer 1 of both branches via VPU broadcast-FMA (state -> lanes 0:16,
    # action -> lanes 64:80).  Avoids padding the 2-wide inputs to 128 lanes.
    h = (s[:, 0:1] * w1_ref[0:1, :] + s[:, 1:2] * w1_ref[1:2, :]
         + a[:, 0:1] * w1_ref[2:3, :] + a[:, 1:2] * w1_ref[3:4, :]
         + b1_ref[...])
    h = jnp.maximum(h, 0.0)

    def dense(x, i, relu):
        y = jnp.dot(x, w_ref[i], preferred_element_type=jnp.float32) + b_ref[i]
        return jnp.maximum(y, 0.0) if relu else y

    h = dense(h, W_L2, relu=True)       # state/action 16->16 (block-diag) + ReLU
    h = dense(h, W_L3, relu=False)      # state/action 16->32 (block-diag): features
    h = dense(h, W_P1, relu=True)       # predfc 64->32 (concat handled by row placement)
    h = dense(h, W_P2, relu=True)       # predfc 32->16
    h = dense(h, W_P3, relu=False)      # predfc 16->2  (only lanes 0:2 valid)

    o_ref[...] = h[:, : o_ref.shape[-1]]


def _round_up(x, m):
    return (x + m - 1) // m * m


def pack_params(params):
    """Pack torch-convention (out,in) weights / (out,) biases into lane-dense tiles."""
    f32 = lambda x: jnp.asarray(x, jnp.float32)
    T = lambda w: f32(w).T              # (out,in) -> (in,out)

    # Layer 1: rows = [state_in0, state_in1, action_in0, action_in1].
    w1 = jnp.zeros((4, P), jnp.float32)
    w1 = w1.at[0:2, 0:16].set(T(params["s1_w"]))
    w1 = w1.at[2:4, A_OFF:A_OFF + 16].set(T(params["a1_w"]))
    b1 = jnp.zeros((1, P), jnp.float32)
    b1 = b1.at[0, 0:16].set(f32(params["s1_b"]))
    b1 = b1.at[0, A_OFF:A_OFF + 16].set(f32(params["a1_b"]))

    def zslot():
        return jnp.zeros((P, P), jnp.float32), jnp.zeros((1, P), jnp.float32)

    # Layer 2 (block-diag 16->16 / 16->16).
    w2, b2 = zslot()
    w2 = w2.at[0:16, 0:16].set(T(params["s2_w"]))
    w2 = w2.at[A_OFF:A_OFF + 16, A_OFF:A_OFF + 16].set(T(params["a2_w"]))
    b2 = b2.at[0, 0:16].set(f32(params["s2_b"]))
    b2 = b2.at[0, A_OFF:A_OFF + 16].set(f32(params["a2_b"]))

    # Layer 3 (block-diag 16->32 / 16->32, no ReLU afterwards).
    w3, b3 = zslot()
    w3 = w3.at[0:16, 0:32].set(T(params["s3_w"]))
    w3 = w3.at[A_OFF:A_OFF + 16, A_OFF:A_OFF + 32].set(T(params["a3_w"]))
    b3 = b3.at[0, 0:32].set(f32(params["s3_b"]))
    b3 = b3.at[0, A_OFF:A_OFF + 32].set(f32(params["a3_b"]))

    # predfc layer 1 (64->32): torch concat(state_feat, action_feat) maps to rows
    # 0:32 (state half) and 64:96 (action half) of the packed tile.
    wp1, bp1 = zslot()
    p1T = T(params["p1_w"])             # (64, 32)
    wp1 = wp1.at[0:32, 0:32].set(p1T[0:32])
    wp1 = wp1.at[A_OFF:A_OFF + 32, 0:32].set(p1T[32:64])
    bp1 = bp1.at[0, 0:32].set(f32(params["p1_b"]))

    wp2, bp2 = zslot()
    wp2 = wp2.at[0:32, 0:16].set(T(params["p2_w"]))
    bp2 = bp2.at[0, 0:16].set(f32(params["p2_b"]))

    wp3, bp3 = zslot()
    wp3 = wp3.at[0:16, 0:2].set(T(params["p3_w"]))
    bp3 = bp3.at[0, 0:2].set(f32(params["p3_b"]))

    W = jnp.stack([w2, w3, wp1, wp2, wp3])        # (5, P, P)
    B = jnp.stack([b2, b3, bp1, bp2, bp3])        # (5, 1, P)
    return w1, b1, W, B


def fmodel_forward(state, action, params, *, tm=512):
    """state/action: (M, 2) float32. Returns (M, 2) float32 predictions."""
    M = state.shape[0]
    w1, b1, W, B = pack_params(params)

    # Row tile: big enough to amortize per-step overhead, never larger than the
    # (sublane-rounded) batch.  VMEM per step stays far under the scoped limit.
    tm = min(tm, _round_up(M, 8))
    Mp = _round_up(M, tm)
    grid = (Mp // tm,)

    s = jnp.pad(state.astype(jnp.float32), ((0, Mp - M), (0, 0)))
    a = jnp.pad(action.astype(jnp.float32), ((0, Mp - M), (0, 0)))

    cost = pl.CostEstimate(
        flops=2 * Mp * P * P * 5 + 8 * Mp * P,
        transcendentals=0,
        bytes_accessed=4 * (2 * Mp * 2 + Mp * 2 + w1.size + b1.size + W.size + B.size),
    )

    out = pl.pallas_call(
        fmodel_kernel,
        out_shape=jax.ShapeDtypeStruct((Mp, 2), jnp.float32),
        grid=grid,
        in_specs=[
            pl.BlockSpec((tm, 2), lambda i: (i, 0)),          # state tile (native width)
            pl.BlockSpec((tm, 2), lambda i: (i, 0)),          # action tile (native width)
            pl.BlockSpec((4, P), lambda i: (0, 0)),           # layer-1 weights (resident)
            pl.BlockSpec((1, P), lambda i: (0, 0)),           # layer-1 bias   (resident)
            pl.BlockSpec((5, P, P), lambda i: (0, 0, 0)),     # packed matmul weights
            pl.BlockSpec((5, 1, P), lambda i: (0, 0, 0)),     # packed biases
        ],
        out_specs=pl.BlockSpec((tm, 2), lambda i: (i, 0)),
        compiler_params=pltpu.CompilerParams(
            dimension_semantics=("parallel",),                # shards across v7x's 2 TCs
            vmem_limit_bytes=32 * 1024 * 1024,
        ),
        cost_estimate=cost,
    )(s, a, w1, b1, W, B)

    return out[:M]


def fmodel_reference(state, action, params):
    """Pure-JAX reference forward (unpadded, f32) for correctness checking."""
    def lin(x, w, b):
        return x @ jnp.asarray(w, jnp.float32).T + jnp.asarray(b, jnp.float32)

    relu = lambda x: jnp.maximum(x, 0.0)
    s = relu(lin(state, params["s1_w"], params["s1_b"]))
    s = relu(lin(s, params["s2_w"], params["s2_b"]))
    s = lin(s, params["s3_w"], params["s3_b"])
    a = relu(lin(action, params["a1_w"], params["a1_b"]))
    a = relu(lin(a, params["a2_w"], params["a2_b"]))
    a = lin(a, params["a3_w"], params["a3_b"])
    f = jnp.concatenate([s, a], axis=1)
    p = relu(lin(f, params["p1_w"], params["p1_b"]))
    p = relu(lin(p, params["p2_w"], params["p2_b"]))
    return lin(p, params["p3_w"], params["p3_b"])


def init_params(key):
    """torch.nn.Linear default init: U(-1/sqrt(in), 1/sqrt(in)) for weight and bias."""
    dims = {
        "s1": (16, 2), "s2": (16, 16), "s3": (32, 16),
        "a1": (16, 2), "a2": (16, 16), "a3": (32, 16),
        "p1": (32, 64), "p2": (16, 32), "p3": (2, 16),
    }
    params = {}
    for name, (out_d, in_d) in dims.items():
        key, kw, kb = jax.random.split(key, 3)
        bound = 1.0 / float(in_d) ** 0.5
        params[f"{name}_w"] = jax.random.uniform(
            kw, (out_d, in_d), jnp.float32, -bound, bound)
        params[f"{name}_b"] = jax.random.uniform(
            kb, (out_d,), jnp.float32, -bound, bound)
    return params


if __name__ == "__main__":
    key = jax.random.PRNGKey(0)
    kp, ks, ka = jax.random.split(key, 3)
    params = init_params(kp)

    batch = 8
    state = jax.random.normal(ks, (batch, 2), dtype=jnp.float32)
    action = jax.random.normal(ka, (batch, 2), dtype=jnp.float32)

    out = fmodel_forward(state, action, params)
    out = jax.block_until_ready(out)

    ref = fmodel_reference(state, action, params)
    assert out.shape == (batch, 2), out.shape
    max_err = float(jnp.max(jnp.abs(out - ref)))
    assert jnp.allclose(out, ref, atol=1e-4, rtol=1e-4), max_err

    print("KERNEL_OK")
</pallas_src>

<mosaic_0001>
module attributes {stable_mosaic.version = 11 : i64} {
  func.func @fmodel_kernel(%arg0: i32, %arg1: memref<8x2xf32, #tpu.memory_space<vmem>>, %arg2: memref<8x2xf32, #tpu.memory_space<vmem>>, %arg3: memref<4x128xf32, #tpu.memory_space<vmem>>, %arg4: memref<1x128xf32, #tpu.memory_space<vmem>>, %arg5: memref<5x128x128xf32, #tpu.memory_space<vmem>>, %arg6: memref<5x1x128xf32, #tpu.memory_space<vmem>>, %arg7: memref<8x2xf32, #tpu.memory_space<vmem>>) attributes {dimension_semantics = [#tpu.dimension_semantics<parallel>], iteration_bounds = array<i64: 1>, scalar_prefetch = 0 : i64, scratch_operands = 0 : i64, tpu.core_type = #tpu.core_type<tc>, window_params = [{transform_indices = @transform_0, window_bounds = array<i64: 8, 2>}, {transform_indices = @transform_1, window_bounds = array<i64: 8, 2>}, {pipeline_mode = #tpu.pipeline_mode<synchronous>, transform_indices = @transform_2, window_bounds = array<i64: 4, 128>}, {pipeline_mode = #tpu.pipeline_mode<synchronous>, transform_indices = @transform_3, window_bounds = array<i64: 1, 128>}, {pipeline_mode = #tpu.pipeline_mode<synchronous>, transform_indices = @transform_4, window_bounds = array<i64: 5, 128, 128>}, {pipeline_mode = #tpu.pipeline_mode<synchronous>, transform_indices = @transform_5, window_bounds = array<i64: 5, 1, 128>}, {transform_indices = @transform_6, window_bounds = array<i64: 8, 2>}]} {
    %c0 = arith.constant 0 : index
    %c0_0 = arith.constant 0 : index
    %0 = vector.load %arg1[%c0, %c0_0] : memref<8x2xf32, #tpu.memory_space<vmem>>, vector<8x2xf32>
    %c0_1 = arith.constant 0 : index
    %c0_2 = arith.constant 0 : index
    %1 = vector.load %arg2[%c0_1, %c0_2] : memref<8x2xf32, #tpu.memory_space<vmem>>, vector<8x2xf32>
    %2 = vector.extract_strided_slice %0 {offsets = [0, 0], sizes = [8, 1], strides = [1, 1]} : vector<8x2xf32> to vector<8x1xf32>
    %c0_3 = arith.constant 0 : index
    %c0_4 = arith.constant 0 : index
    %3 = vector.load %arg3[%c0_3, %c0_4] : memref<4x128xf32, #tpu.memory_space<vmem>>, vector<1x128xf32>
    %4 = vector.broadcast %2 : vector<8x1xf32> to vector<8x128xf32>
    %5 = vector.broadcast %3 : vector<1x128xf32> to vector<8x128xf32>
    %6 = arith.mulf %4, %5 : vector<8x128xf32>
    %7 = vector.extract_strided_slice %0 {offsets = [0, 1], sizes = [8, 1], strides = [1, 1]} : vector<8x2xf32> to vector<8x1xf32>
    %c1 = arith.constant 1 : index
    %c0_5 = arith.constant 0 : index
    %8 = vector.load %arg3[%c1, %c0_5] : memref<4x128xf32, #tpu.memory_space<vmem>>, vector<1x128xf32>
    %9 = vector.broadcast %7 : vector<8x1xf32> to vector<8x128xf32>
    %10 = vector.broadcast %8 : vector<1x128xf32> to vector<8x128xf32>
    %11 = arith.mulf %9, %10 : vector<8x128xf32>
    %12 = arith.addf %6, %11 : vector<8x128xf32>
    %13 = vector.extract_strided_slice %1 {offsets = [0, 0], sizes = [8, 1], strides = [1, 1]} : vector<8x2xf32> to vector<8x1xf32>
    %c2 = arith.constant 2 : index
    %c0_6 = arith.constant 0 : index
    %14 = vector.load %arg3[%c2, %c0_6] : memref<4x128xf32, #tpu.memory_space<vmem>>, vector<1x128xf32>
    %15 = vector.broadcast %13 : vector<8x1xf32> to vector<8x128xf32>
    %16 = vector.broadcast %14 : vector<1x128xf32> to vector<8x128xf32>
    %17 = arith.mulf %15, %16 : vector<8x128xf32>
    %18 = arith.addf %12, %17 : vector<8x128xf32>
    %19 = vector.extract_strided_slice %1 {offsets = [0, 1], sizes = [8, 1], strides = [1, 1]} : vector<8x2xf32> to vector<8x1xf32>
    %c3 = arith.constant 3 : index
    %c0_7 = arith.constant 0 : index
    %20 = vector.load %arg3[%c3, %c0_7] : memref<4x128xf32, #tpu.memory_space<vmem>>, vector<1x128xf32>
    %21 = vector.broadcast %19 : vector<8x1xf32> to vector<8x128xf32>
    %22 = vector.broadcast %20 : vector<1x128xf32> to vector<8x128xf32>
    %23 = arith.mulf %21, %22 : vector<8x128xf32>
    %24 = arith.addf %18, %23 : vector<8x128xf32>
    %c0_8 = arith.constant 0 : index
    %c0_9 = arith.constant 0 : index
    %25 = vector.load %arg4[%c0_8, %c0_9] : memref<1x128xf32, #tpu.memory_space<vmem>>, vector<1x128xf32>
    %26 = vector.broadcast %25 : vector<1x128xf32> to vector<8x128xf32>
    %27 = arith.addf %24, %26 : vector<8x128xf32>
    %cst = arith.constant 0.000000e+00 : f32
    %28 = vector.broadcast %cst : f32 to vector<8x128xf32>
    %29 = arith.maximumf %27, %28 : vector<8x128xf32>
    %c0_10 = arith.constant 0 : index
    %c0_11 = arith.constant 0 : index
    %c0_12 = arith.constant 0 : index
    %30 = vector.load %arg5[%c0_10, %c0_11, %c0_12] : memref<5x128x128xf32, #tpu.memory_space<vmem>>, vector<1x128x128xf32>
    %31 = vector.shape_cast %30 : vector<1x128x128xf32> to vector<128x128xf32>
    %cst_13 = arith.constant dense<0.000000e+00> : vector<8x128xf32>
    %32 = tpu.matmul %29, %31, %cst_13 {dimension_numbers = #tpu.dot_dimension_numbers<[1], [0], [0], [1], [0, 0, 1, 1], [], []>} : vector<8x128xf32>, vector<128x128xf32>, vector<8x128xf32> -> vector<8x128xf32>
    %c0_14 = arith.constant 0 : index
    %c0_15 = arith.constant 0 : index
    %c0_16 = arith.constant 0 : index
    %33 = vector.load %arg6[%c0_14, %c0_15, %c0_16] : memref<5x1x128xf32, #tpu.memory_space<vmem>>, vector<1x1x128xf32>
    %34 = vector.shape_cast %33 : vector<1x1x128xf32> to vector<1x128xf32>
    %35 = vector.broadcast %34 : vector<1x128xf32> to vector<8x128xf32>
    %36 = arith.addf %32, %35 : vector<8x128xf32>
    %cst_17 = arith.constant 0.000000e+00 : f32
    %37 = vector.broadcast %cst_17 : f32 to vector<8x128xf32>
    %38 = arith.maximumf %36, %37 : vector<8x128xf32>
    %c1_18 = arith.constant 1 : index
    %c0_19 = arith.constant 0 : index
    %c0_20 = arith.constant 0 : index
    %39 = vector.load %arg5[%c1_18, %c0_19, %c0_20] : memref<5x128x128xf32, #tpu.memory_space<vmem>>, vector<1x128x128xf32>
    %40 = vector.shape_cast %39 : vector<1x128x128xf32> to vector<128x128xf32>
    %cst_21 = arith.constant dense<0.000000e+00> : vector<8x128xf32>
    %41 = tpu.matmul %38, %40, %cst_21 {dimension_numbers = #tpu.dot_dimension_numbers<[1], [0], [0], [1], [0, 0, 1, 1], [], []>} : vector<8x128xf32>, vector<128x128xf32>, vector<8x128xf32> -> vector<8x128xf32>
    %c1_22 = arith.constant 1 : index
    %c0_23 = arith.constant 0 : index
    %c0_24 = arith.constant 0 : index
    %42 = vector.load %arg6[%c1_22, %c0_23, %c0_24] : memref<5x1x128xf32, #tpu.memory_space<vmem>>, vector<1x1x128xf32>
    %43 = vector.shape_cast %42 : vector<1x1x128xf32> to vector<1x128xf32>
    %44 = vector.broadcast %43 : vector<1x128xf32> to vector<8x128xf32>
    %45 = arith.addf %41, %44 : vector<8x128xf32>
    %c2_25 = arith.constant 2 : index
    %c0_26 = arith.constant 0 : index
    %c0_27 = arith.constant 0 : index
    %46 = vector.load %arg5[%c2_25, %c0_26, %c0_27] : memref<5x128x128xf32, #tpu.memory_space<vmem>>, vector<1x128x128xf32>
    %47 = vector.shape_cast %46 : vector<1x128x128xf32> to vector<128x128xf32>
    %cst_28 = arith.constant dense<0.000000e+00> : vector<8x128xf32>
    %48 = tpu.matmul %45, %47, %cst_28 {dimension_numbers = #tpu.dot_dimension_numbers<[1], [0], [0], [1], [0, 0, 1, 1], [], []>} : vector<8x128xf32>, vector<128x128xf32>, vector<8x128xf32> -> vector<8x128xf32>
    %c2_29 = arith.constant 2 : index
    %c0_30 = arith.constant 0 : index
    %c0_31 = arith.constant 0 : index
    %49 = vector.load %arg6[%c2_29, %c0_30, %c0_31] : memref<5x1x128xf32, #tpu.memory_space<vmem>>, vector<1x1x128xf32>
    %50 = vector.shape_cast %49 : vector<1x1x128xf32> to vector<1x128xf32>
    %51 = vector.broadcast %50 : vector<1x128xf32> to vector<8x128xf32>
    %52 = arith.addf %48, %51 : vector<8x128xf32>
    %cst_32 = arith.constant 0.000000e+00 : f32
    %53 = vector.broadcast %cst_32 : f32 to vector<8x128xf32>
    %54 = arith.maximumf %52, %53 : vector<8x128xf32>
    %c3_33 = arith.constant 3 : index
    %c0_34 = arith.constant 0 : index
    %c0_35 = arith.constant 0 : index
    %55 = vector.load %arg5[%c3_33, %c0_34, %c0_35] : memref<5x128x128xf32, #tpu.memory_space<vmem>>, vector<1x128x128xf32>
    %56 = vector.shape_cast %55 : vector<1x128x128xf32> to vector<128x128xf32>
    %cst_36 = arith.constant dense<0.000000e+00> : vector<8x128xf32>
    %57 = tpu.matmul %54, %56, %cst_36 {dimension_numbers = #tpu.dot_dimension_numbers<[1], [0], [0], [1], [0, 0, 1, 1], [], []>} : vector<8x128xf32>, vector<128x128xf32>, vector<8x128xf32> -> vector<8x128xf32>
    %c3_37 = arith.constant 3 : index
    %c0_38 = arith.constant 0 : index
    %c0_39 = arith.constant 0 : index
    %58 = vector.load %arg6[%c3_37, %c0_38, %c0_39] : memref<5x1x128xf32, #tpu.memory_space<vmem>>, vector<1x1x128xf32>
    %59 = vector.shape_cast %58 : vector<1x1x128xf32> to vector<1x128xf32>
    %60 = vector.broadcast %59 : vector<1x128xf32> to vector<8x128xf32>
    %61 = arith.addf %57, %60 : vector<8x128xf32>
    %cst_40 = arith.constant 0.000000e+00 : f32
    %62 = vector.broadcast %cst_40 : f32 to vector<8x128xf32>
    %63 = arith.maximumf %61, %62 : vector<8x128xf32>
    %c4 = arith.constant 4 : index
    %c0_41 = arith.constant 0 : index
    %c0_42 = arith.constant 0 : index
    %64 = vector.load %arg5[%c4, %c0_41, %c0_42] : memref<5x128x128xf32, #tpu.memory_space<vmem>>, vector<1x128x128xf32>
    %65 = vector.shape_cast %64 : vector<1x128x128xf32> to vector<128x128xf32>
    %cst_43 = arith.constant dense<0.000000e+00> : vector<8x128xf32>
    %66 = tpu.matmul %63, %65, %cst_43 {dimension_numbers = #tpu.dot_dimension_numbers<[1], [0], [0], [1], [0, 0, 1, 1], [], []>} : vector<8x128xf32>, vector<128x128xf32>, vector<8x128xf32> -> vector<8x128xf32>
    %c4_44 = arith.constant 4 : index
    %c0_45 = arith.constant 0 : index
    %c0_46 = arith.constant 0 : index
    %67 = vector.load %arg6[%c4_44, %c0_45, %c0_46] : memref<5x1x128xf32, #tpu.memory_space<vmem>>, vector<1x1x128xf32>
    %68 = vector.shape_cast %67 : vector<1x1x128xf32> to vector<1x128xf32>
    %69 = vector.broadcast %68 : vector<1x128xf32> to vector<8x128xf32>
    %70 = arith.addf %66, %69 : vector<8x128xf32>
    %71 = vector.extract_strided_slice %70 {offsets = [0, 0], sizes = [8, 2], strides = [1, 1]} : vector<8x128xf32> to vector<8x2xf32>
    %c0_47 = arith.constant 0 : index
    %c0_48 = arith.constant 0 : index
    %72 = vector.load %arg7[%c0_47, %c0_48] : memref<8x2xf32, #tpu.memory_space<vmem>>, vector<8x2xf32>
    tpu.vector_store %arg7[%c0_47, %c0_48], %71 {strides = array<i32>} : memref<8x2xf32, #tpu.memory_space<vmem>>, vector<8x2xf32>,
    return
  }
  func.func @transform_0(%arg0: i32) -> (i32, i32) {
    %c0_i32 = arith.constant 0 : i32
    %c0_i32_0 = arith.constant 0 : i32
    return %arg0, %c0_i32 : i32, i32
  }
  func.func @transform_1(%arg0: i32) -> (i32, i32) {
    %c0_i32 = arith.constant 0 : i32
    %c0_i32_0 = arith.constant 0 : i32
    return %arg0, %c0_i32 : i32, i32
  }
  func.func @transform_2(%arg0: i32) -> (i32, i32) {
    %c0_i32 = arith.constant 0 : i32
    %c0_i32_0 = arith.constant 0 : i32
    %c0_i32_1 = arith.constant 0 : i32
    return %c0_i32, %c0_i32_0 : i32, i32
  }
  func.func @transform_3(%arg0: i32) -> (i32, i32) {
    %c0_i32 = arith.constant 0 : i32
    %c0_i32_0 = arith.constant 0 : i32
    %c0_i32_1 = arith.constant 0 : i32
    return %c0_i32, %c0_i32_0 : i32, i32
  }
  func.func @transform_4(%arg0: i32) -> (i32, i32, i32) {
    %c0_i32 = arith.constant 0 : i32
    %c0_i32_0 = arith.constant 0 : i32
    %c0_i32_1 = arith.constant 0 : i32
    %c0_i32_2 = arith.constant 0 : i32
    return %c0_i32, %c0_i32_0, %c0_i32_1 : i32, i32, i32
  }
  func.func @transform_5(%arg0: i32) -> (i32, i32, i32) {
    %c0_i32 = arith.constant 0 : i32
    %c0_i32_0 = arith.constant 0 : i32
    %c0_i32_1 = arith.constant 0 : i32
    %c0_i32_2 = arith.constant 0 : i32
    return %c0_i32, %c0_i32_0, %c0_i32_1 : i32, i32, i32
  }
  func.func @transform_6(%arg0: i32) -> (i32, i32) {
    %c0_i32 = arith.constant 0 : i32
    %c0_i32_0 = arith.constant 0 : i32
    return %arg0, %c0_i32 : i32, i32
  }
}

</mosaic_0001>

<bundles_post_ra>
// kernel: tpu_custom_call.1
= control target key start
LH: loop header
LB: loop body
LE: loop exit
PB: predicated region body
PF: predicated region fallthrough
CT: control target
= control target key end

     0   :  { %11 = vsyncpa [#allocation3], 0  ;;  %s1006_s21 = smov [#allocation2]   ;;  %s1150_s0 = inlined_call_operand.vmem [shape: f32[8,2], index: 0, kind: input, shape index: {}]   ;;  %s1151_s1 = inlined_call_operand.vmem [shape: f32[8,2], index: 1, kind: input, shape index: {}]   ;;  %s1152_s2 = inlined_call_operand.vmem [shape: f32[4,128], index: 2, kind: input, shape index: {}]   ;;  %s1153_s3 = inlined_call_operand.vmem [shape: f32[1,128], index: 3, kind: input, shape index: {}]   ;;  %s1154_s4 = inlined_call_operand.hbm [shape: f32[5,128,128], index: 4, kind: input, shape index: {}]   ;;  %s1155_s5 = inlined_call_operand.vmem [shape: f32[5,1,128], index: 5, kind: input, shape index: {}]   ;;  %s1156_s6 = inlined_call_operand.vmem [shape: f32[8,2], index: 6, kind: output, shape index: {}]  }
   0x1   :  { %s25_s22 = sshll.u32 %s1006_s21, 4  ;;  %s982_s25 = scalar_lea.hbm %s1154_s4, 10240  ;;  %s26_s22 = int_to_ptr.vmem [resolvable:$true] %s25_s22 }
   0x2   :  { %p983_p0 = scmp.ne.s32.totalorder %s1154_s4, %s982_s25  ;;  %p986_p1 = scmp.lt.u32.totalorder %s982_s25, %s1154_s4 }
   0x4   :  { %p988_p2 = pnand %p986_p1, %p983_p0 }
   0x6   :  { %991 = shalt.err (!%p988_p2)
}
   0x7   :  { %s992_s30 = scalar_lea.vmem %s26_s22, 10240  ;;  %p997_p4 = scmp.lt.s32.totalorder %s26_s22, %s26_s22 }
   0x8   :  { %p993_p3 = scmp.ne.s32.totalorder %s26_s22, %s992_s30  ;;  %p998_p5 = scmp.lt.s32.totalorder %s992_s30, %s992_s30 }
   0xa   :  { %p999_p6 = por %p998_p5, %p997_p4 }
   0xc   :  { %p1000_p7 = pnand %p999_p6, %p993_p3 }
   0xe   :  { %1003 = shalt.err (!%p1000_p7)
}
   0xf   :  { %s1007_s7 = smov 128   ;;  %s1008_s8 = smov 8  }
  0x10   :  { %31 = dma.hbm_to_vmem [thread:$0]  %s1154_s4, 10240, %s26_s22, [#allocation3], %s1007_s7, %s1007_s7, %s1008_s8  }
  0x11   :  { %1004 = dma.done.wait [#allocation3], 10240  }
  0x12   :  { %1005 = vsyncadd [#allocation3], 4294957056  ;;  %v1009_v0 = vmov 0   ;;  %v1010_v1 = vmov 0.0|0.0   ;;  %v37_v2 = vld [vmem:[%s1150_s0] sm:$0xff]  ;;  %v93_v4 = vld [vmem:[#allocation2] sm:$0xff] }
  0x13   :  { %978 = vset.pattern.permute.xlu0 %v1009_v0  ;;  %980 = vset.pattern.permute.xlu1 %v1009_v0  ;;  %v38_v3 = vld [vmem:[%s1151_s1] sm:$0xff]  ;;  %v94_v5 = vld [vmem:[#allocation2 + $0x8] sm:$0xff]  ;;  %v95_v6 = vld [vmem:[#allocation2 + $0x10] sm:$0xff]  ;;  %v1011_v10 = vmov 1   ;;  %vm1012_vm0 = vmmov 0   ;;  %v1013_v19 = vmov 0.0  }
  0x14   :  { %850 = vmatprep.subr.bf16.mxu0 %v1010_v1  ;;  %874 = vmatprep.subr.bf16.mxu1 %v1010_v1  ;;  %v96_v7 = vld [vmem:[#allocation2 + $0x18] sm:$0xff]  ;;  %v851_v8 = vpack.c.bf16 %v94_v5, %v93_v4  ;;  %v97_v11 = vld [vmem:[#allocation2 + $0x20] sm:$0xff]  ;;  %v98_v12 = vld [vmem:[#allocation2 + $0x28] sm:$0xff]  ;;  %vm569_vm1 = vcmask 15360  }
  0x15   :  { %42 = vperm.xlu0 %978, %v37_v2   ;;  %64 = vperm.xlu1 %980, %v38_v3   ;;  %v854_v9 = vpack.c.bf16 %v96_v7, %v95_v6  ;;  %v857_v13 = vpack.c.bf16 %v98_v12, %v97_v11  ;;  %v99_v14 = vld [vmem:[#allocation2 + $0x30] sm:$0xff]  ;;  %v100_v15 = vld [vmem:[#allocation2 + $0x38] sm:$0xff]  ;;  %v101_v17 = vld [vmem:[#allocation2 + $0x40] sm:$0xff] }
  0x16   :  { %852 = vmatpush3.bf16.msra.mxu0 %v851_v8  ;;  %v860_v16 = vpack.c.bf16 %v100_v15, %v99_v14  ;;  %v102_v18 = vld [vmem:[#allocation2 + $0x48] sm:$0xff]  ;;  %707 = vmatprep.mubr.msk.f32.mxu0 %vm1012_vm0, %v1013_v19  ;;  %v103_v21 = vld [vmem:[#allocation2 + $0x50] sm:$0xff]  ;;  %v104_v22 = vld [vmem:[#allocation2 + $0x58] sm:$0xff] }
  0x17   :  { %853 = vmatprep.subr.bf16.mxu0 %v1010_v1  ;;  %742 = vmatprep.mubr.msk.f32.mxu1 %vm1012_vm0, %v1013_v19  ;;  %v863_v20 = vpack.c.bf16 %v102_v18, %v101_v17  ;;  %v188_v23 = vld [vmem:[#allocation2 + $0x80] sm:$0xff]  ;;  %v189_v24 = vld [vmem:[#allocation2 + $0x88] sm:$0xff]  ;;  %v190_v25 = vld [vmem:[#allocation2 + $0x90] sm:$0xff]  ;;  %v866_v28 = vpack.c.bf16 %v104_v22, %v103_v21 }
  0x18   :  { %v875_v26 = vpack.c.bf16 %v189_v24, %v188_v23  ;;  %v191_v27 = vld [vmem:[#allocation2 + $0x98] sm:$0xff]  ;;  %v105_v29 = vld [vmem:[#allocation2 + $0x60] sm:$0xff]  ;;  %v106_v30 = vld [vmem:[#allocation2 + $0x68] sm:$0xff] }
  0x19   :  { %979 = vset.pattern.permute.xlu0 %v1011_v10  ;;  %981 = vset.pattern.permute.xlu1 %v1011_v10  ;;  %v878_v31 = vpack.c.bf16 %v191_v27, %v190_v25  ;;  %v192_v32 = vld [vmem:[#allocation2 + $0xa0] sm:$0xff]  ;;  %v193_v33 = vld [vmem:[#allocation2 + $0xa8] sm:$0xff]  ;;  %v869_v34 = vpack.c.bf16 %v106_v30, %v105_v29  ;;  %v107_v35 = vld [vmem:[#allocation2 + $0x70] sm:$0xff] }
  0x1a   :  { %52 = vperm.xlu0 %979, %v37_v2   ;;  %75 = vperm.xlu1 %981, %v38_v3   ;;  %v108_v36 = vld [vmem:[#allocation2 + $0x78] sm:$0xff]  ;;  %v881_v37 = vpack.c.bf16 %v193_v33, %v192_v32  ;;  %v194_v38 = vld [vmem:[#allocation2 + $0xb0] sm:$0xff]  ;;  %v196_v42 = vld [vmem:[#allocation2 + $0xc0] sm:$0xff] }
  0x1b   :  { %855 = vmatpush3.bf16.msra.mxu0 %v854_v9  ;;  %876 = vmatpush3.bf16.msra.mxu1 %v875_v26  ;;  %v195_v39 = vld [vmem:[#allocation2 + $0xb8] sm:$0xff]  ;;  %v872_v40 = vpack.c.bf16 %v108_v36, %v107_v35  ;;  %v197_v43 = vld [vmem:[#allocation2 + $0xc8] sm:$0xff]  ;;  %v198_v45 = vld [vmem:[#allocation2 + $0xd0] sm:$0xff] }
  0x1c   :  { %856 = vmatprep.subr.bf16.mxu0 %v1010_v1  ;;  %877 = vmatprep.subr.bf16.mxu1 %v1010_v1  ;;  %v884_v41 = vpack.c.bf16 %v195_v39, %v194_v38  ;;  %v887_v44 = vpack.c.bf16 %v197_v43, %v196_v42  ;;  %v199_v46 = vld [vmem:[#allocation2 + $0xd8] sm:$0xff]  ;;  %v200_v48 = vld [vmem:[#allocation2 + $0xe0] sm:$0xff]  ;;  %v201_v49 = vld [vmem:[#allocation2 + $0xe8] sm:$0xff] }
  0x1d   :  { %v890_v47 = vpack.c.bf16 %v199_v46, %v198_v45  ;;  %v893_v50 = vpack.c.bf16 %v201_v49, %v200_v48  ;;  %v576_v53 = vld [vmem:[%s1152_s2] ss:$0 sm:$0xff]  ;;  %v577_v54 = vld [vmem:[%s1152_s2 + $0x1] ss:$0 sm:$0xff]  ;;  %v578_v55 = vld [vmem:[%s1152_s2 + $0x2] ss:$0 sm:$0xff] }
  0x1e   :  { %v579_v57 = vld [vmem:[%s1152_s2 + $0x3] ss:$0 sm:$0xff]  ;;  %v580_v2 = vld [vmem:[%s1153_s3] ss:$0 sm:$0xff]  ;;  %v202_v6 = vld [vmem:[#allocation2 + $0xf0] sm:$0xff] }
  0x1f   :  { %858 = vmatpush3.bf16.msra.mxu0 %v857_v13  ;;  %879 = vmatpush3.bf16.msra.mxu1 %v878_v31  ;;  %v203_v7 = vld [vmem:[#allocation2 + $0xf8] sm:$0xff]  ;;  %v283_v9 = vld [vmem:[#allocation2 + $0x100] sm:$0xff]  ;;  %v284_v10 = vld [vmem:[#allocation2 + $0x108] sm:$0xff] }
  0x20   :  { %859 = vmatprep.subr.bf16.mxu0 %v1010_v1  ;;  %880 = vmatprep.subr.bf16.mxu1 %v1010_v1  ;;  %v896_v8 = vpack.c.bf16 %v203_v7, %v202_v6  ;;  %v285_v11 = vld [vmem:[#allocation2 + $0x110] sm:$0xff]  ;;  %v899_v12 = vpack.c.bf16 %v284_v10, %v283_v9  ;;  %v286_v13 = vld [vmem:[#allocation2 + $0x118] sm:$0xff]  ;;  %v287_v15 = vld [vmem:[#allocation2 + $0x120] sm:$0xff] }
  0x21   :  { %v902_v14 = vpack.c.bf16 %v286_v13, %v285_v11  ;;  %v289_v18 = vld [vmem:[#allocation2 + $0x130] sm:$0xff]  ;;  %v291_v22 = vld [vmem:[#allocation2 + $0x140] sm:$0xff]  ;;  %v292_v23 = vld [vmem:[#allocation2 + $0x148] sm:$0xff] }
  0x22   :  { %v911_v24 = vpack.c.bf16 %v292_v23, %v291_v22  ;;  %v293_v25 = vld [vmem:[#allocation2 + $0x150] sm:$0xff]  ;;  %v294_v26 = vld [vmem:[#allocation2 + $0x158] sm:$0xff]  ;;  %v296_v29 = vld [vmem:[#allocation2 + $0x168] sm:$0xff] }
  0x23   :  { %861 = vmatpush3.bf16.msra.mxu0 %v860_v16  ;;  %882 = vmatpush3.bf16.msra.mxu1 %v881_v37  ;;  %v288_v16 = vld [vmem:[#allocation2 + $0x128] sm:$0xff]  ;;  %v914_v27 = vpack.c.bf16 %v294_v26, %v293_v25  ;;  %v581_v31 = vld [vmem:[%s1155_s5] ss:$0 sm:$0xff]  ;;  %v297_v36 = vld [vmem:[#allocation2 + $0x170] sm:$0xff] }
  0x24   :  { %862 = vmatprep.subr.bf16.mxu0 %v1010_v1  ;;  %883 = vmatprep.subr.bf16.mxu1 %v1010_v1  ;;  %v905_v17 = vpack.c.bf16 %v288_v16, %v287_v15  ;;  %v298_v37 = vld [vmem:[#allocation2 + $0x178] sm:$0xff]  ;;  %v379_v39 = vld [vmem:[#allocation2 + $0x180] sm:$0xff]  ;;  %v384_v46 = vld [vmem:[#allocation2 + $0x1a8] sm:$0xff] }
  0x25   :  { %v920_v38 = vpack.c.bf16 %v298_v37, %v297_v36  ;;  %v382_v43 = vld [vmem:[#allocation2 + $0x198] sm:$0xff]  ;;  %v383_v45 = vld [vmem:[#allocation2 + $0x1a0] sm:$0xff]  ;;  %v385_v48 = vld [vmem:[#allocation2 + $0x1b0] sm:$0xff] }
  0x26   :  { %v386_v49 = vld [vmem:[#allocation2 + $0x1b8] sm:$0xff]  ;;  %v477_v6 = vld [vmem:[#allocation2 + $0x210] sm:$0xff]  ;;  %v479_v10 = vld [vmem:[#allocation2 + $0x220] sm:$0xff] }
  0x27   :  { %864 = vmatpush3.bf16.msra.mxu0 %v863_v20  ;;  %885 = vmatpush3.bf16.msra.mxu1 %v884_v41  ;;  %v290_v20 = vld [vmem:[#allocation2 + $0x138] sm:$0xff]  ;;  %v381_v41 = vld [vmem:[#allocation2 + $0x190] sm:$0xff]  ;;  %v480_v11 = vld [vmem:[#allocation2 + $0x228] sm:$0xff] }
  0x28   :  { %865 = vmatprep.subr.bf16.mxu0 %v1010_v1  ;;  %886 = vmatprep.subr.bf16.mxu1 %v1010_v1  ;;  %v908_v21 = vpack.c.bf16 %v290_v20, %v289_v18  ;;  %v482_v13 = vld [vmem:[#allocation2 + $0x238] sm:$0xff]  ;;  %v483_v15 = vld [vmem:[#allocation2 + $0x240] sm:$0xff]  ;;  %v484_v16 = vld [vmem:[#allocation2 + $0x248] sm:$0xff] }
  0x29   :  { %v485_v18 = vld [vmem:[#allocation2 + $0x250] sm:$0xff]  ;;  %v486_v20 = vld [vmem:[#allocation2 + $0x258] sm:$0xff]  ;;  %v487_v22 = vld [vmem:[#allocation2 + $0x260] sm:$0xff] }
  0x2a   :  { %v488_v23 = vld [vmem:[#allocation2 + $0x268] sm:$0xff]  ;;  %v585_v25 = vld [vmem:[%s1155_s5 + $0x2] ss:$0 sm:$0xff]  ;;  %v589_v37 = vld [vmem:[%s1155_s5 + $0x4] ss:$0 sm:$0xff] }
  0x2b   :  { %867 = vmatpush3.bf16.msra.mxu0 %v866_v28  ;;  %888 = vmatpush3.bf16.msra.mxu1 %v887_v44  ;;  %v295_v28 = vld [vmem:[#allocation2 + $0x160] sm:$0xff]  ;;  %v926_v44 = vpack.c.bf16 %v382_v43, %v381_v41 }
  0x2c   :  { %868 = vmatprep.subr.bf16.mxu0 %v1010_v1  ;;  %889 = vmatprep.subr.bf16.mxu1 %v1010_v1  ;;  %v917_v30 = vpack.c.bf16 %v296_v29, %v295_v28 }
  0x2f   :  { %870 = vmatpush3.bf16.msra.mxu0 %v869_v34  ;;  %891 = vmatpush3.bf16.msra.mxu1 %v890_v47  ;;  %v929_v47 = vpack.c.bf16 %v384_v46, %v383_v45 }
  0x30   :  { %871 = vmatprep.subr.bf16.mxu0 %v1010_v1  ;;  %892 = vmatprep.subr.bf16.mxu1 %v1010_v1 }
  0x33   :  { %873 = vmatpush3.bf16.msra.mxu0 %v872_v40  ;;  %894 = vmatpush3.bf16.msra.mxu1 %v893_v50  ;;  %v380_v40 = vld [vmem:[#allocation2 + $0x188] sm:$0xff]  ;;  %v932_v50 = vpack.c.bf16 %v386_v49, %v385_v48 }
  0x34   :  { %898 = vmatprep.subr.bf16.mxu0 %v1010_v1  ;;  %895 = vmatprep.subr.bf16.mxu1 %v1010_v1  ;;  %v923_v42 = vpack.c.bf16 %v380_v40, %v379_v39 }
  0x37   :  { %897 = vmatpush3.bf16.msra.mxu1 %v896_v8  ;;  %v478_v8 = vld [vmem:[#allocation2 + $0x218] sm:$0xff] }
  0x38   :  { %922 = vmatprep.subr.bf16.mxu1 %v1010_v1  ;;  %v950_v9 = vpack.c.bf16 %v478_v8, %v477_v6 }
  0x94   :  { %v43_v51 = vpop.permute.xlu0 %42  ;;  %v65_v52 = vpop.permute.xlu1 %64 }
  0x95   :  { %v49_v59 = vmul.f32 %v576_v53, %v43_v51  ;;  %v71_v61 = vmul.f32 %v578_v55, %v65_v52  ;;  %v387_v51 = vld [vmem:[#allocation2 + $0x1c0] sm:$0xff]  ;;  %v388_v52 = vld [vmem:[#allocation2 + $0x1c8] sm:$0xff]  ;;  %v390_v55 = vld [vmem:[#allocation2 + $0x1d8] sm:$0xff] }
  0x96   :  { %v935_v53 = vpack.c.bf16 %v388_v52, %v387_v51 }
  0x99   :  { %v53_v56 = vpop.permute.xlu0 %52  ;;  %v76_v58 = vpop.permute.xlu1 %75 }
  0x9a   :  { %v59_v60 = vmul.f32 %v577_v54, %v53_v56  ;;  %v82_v63 = vmul.f32 %v579_v57, %v76_v58  ;;  %v389_v54 = vld [vmem:[#allocation2 + $0x1d0] sm:$0xff]  ;;  %v391_v57 = vld [vmem:[#allocation2 + $0x1e0] sm:$0xff]  ;;  %v392_v58 = vld [vmem:[#allocation2 + $0x1e8] sm:$0xff] }
  0x9b   :  { %v938_v56 = vpack.c.bf16 %v390_v55, %v389_v54 }
  0x9c   :  { %v60_v62 = vadd.f32 %v59_v60, %v49_v59  ;;  %v941_v59 = vpack.c.bf16 %v392_v58, %v391_v57  ;;  %v583_v60 = vld [vmem:[%s1155_s5 + $0x1] ss:$0 sm:$0xff] }
  0x9e   :  { %v72_v0 = vadd.f32 %v71_v61, %v60_v62 }
  0xa0   :  { %v83_v3 = vadd.f32 %v82_v63, %v72_v0  ;;  %v393_v0 = vld [vmem:[#allocation2 + $0x1f0] sm:$0xff] }
  0xa2   :  { %v91_v4 = vadd.f32 %v580_v2, %v83_v3  ;;  %v394_v2 = vld [vmem:[#allocation2 + $0x1f8] sm:$0xff] }
  0xa3   :  { %v944_v3 = vpack.c.bf16 %v394_v2, %v393_v0 }
  0xa4   :  { %v92_v5 = vmax.f32 %v91_v4, 0.0  ;;  %v475_v4 = vld [vmem:[#allocation2 + $0x200] sm:$0xff] }
  0xa6   :  { %708 = vmatmul.mubr.f32.vlgmr.msra.gmra.mrb[0].mxu0 %v92_v5  ;;  %v476_v5 = vld [vmem:[#allocation2 + $0x208] sm:$0xff] }
  0xa7   :  { %777 = vmatprep.mubr.msk.f32.mxu0 %vm1012_vm0, %v1013_v19  ;;  %900 = vmatpush3.bf16.msra.mxu0 %v899_v12  ;;  %v947_v7 = vpack.c.bf16 %v476_v5, %v475_v4  ;;  %v953_v12 = vpack.c.bf16 %v480_v11, %v479_v10 }
  0xa8   :  { %901 = vmatprep.subr.bf16.mxu0 %v1010_v1 }
  0xab   :  { %903 = vmatpush3.bf16.msra.mxu0 %v902_v14 }
  0xac   :  { %904 = vmatprep.subr.bf16.mxu0 %v1010_v1 }
  0xaf   :  { %906 = vmatpush3.bf16.msra.mxu0 %v905_v17  ;;  %v959_v17 = vpack.c.bf16 %v484_v16, %v483_v15 }
  0xb0   :  { %907 = vmatprep.subr.bf16.mxu0 %v1010_v1 }
  0xb3   :  { %909 = vmatpush3.bf16.msra.mxu0 %v908_v21  ;;  %v962_v21 = vpack.c.bf16 %v486_v20, %v485_v18 }
  0xb4   :  { %910 = vmatprep.subr.bf16.mxu0 %v1010_v1 }
  0xb7   :  { %912 = vmatpush3.bf16.msra.mxu0 %v911_v24  ;;  %v965_v24 = vpack.c.bf16 %v488_v23, %v487_v22 }
  0xb8   :  { %913 = vmatprep.subr.bf16.mxu0 %v1010_v1 }
  0xbb   :  { %915 = vmatpush3.bf16.msra.mxu0 %v914_v27 }
  0xbc   :  { %916 = vmatprep.subr.bf16.mxu0 %v1010_v1 }
  0xbf   :  { %918 = vmatpush3.bf16.msra.mxu0 %v917_v30  ;;  %v489_v30 = vld [vmem:[#allocation2 + $0x270] sm:$0xff] }
  0xc0   :  { %919 = vmatprep.subr.bf16.mxu0 %v1010_v1 }
  0xc3   :  { %921 = vmatpush3.bf16.msra.mxu0 %v920_v38 }
  0xc4   :  { %946 = vmatprep.subr.bf16.mxu0 %v1010_v1 }
 0x179   :  { %v182_v32 = vpop.f32.mrb[0].mxu0 }
 0x17a   :  { %v183_v33 = vadd.f32 %v581_v31, %v182_v32  ;;  %v709_v34 = vpop.f32.mrb[1].mxu0  ;;  %v490_v31 = vld [vmem:[#allocation2 + $0x278] sm:$0xff] }
 0x17b   :  { %v968_v32 = vpack.c.bf16 %v490_v31, %v489_v30 }
 0x17c   :  { %v186_v35 = vmax.f32 %v183_v33, 0.0  ;;  %v587_v33 = vld [vmem:[%s1155_s5 + $0x3] ss:$0 sm:$0xff] }
 0x17e   :  { %743 = vmatmul.mubr.f32.vlgmr.msra.gmra.mrb[0].mxu1 %v186_v35 }
 0x17f   :  { %812 = vmatprep.mubr.msk.f32.mxu1 %vm1012_vm0, %v1013_v19  ;;  %924 = vmatpush3.bf16.msra.mxu1 %v923_v42 }
 0x180   :  { %925 = vmatprep.subr.bf16.mxu1 %v1010_v1 }
 0x183   :  { %927 = vmatpush3.bf16.msra.mxu1 %v926_v44 }
 0x184   :  { %928 = vmatprep.subr.bf16.mxu1 %v1010_v1 }
 0x187   :  { %930 = vmatpush3.bf16.msra.mxu1 %v929_v47 }
 0x188   :  { %931 = vmatprep.subr.bf16.mxu1 %v1010_v1 }
 0x18b   :  { %933 = vmatpush3.bf16.msra.mxu1 %v932_v50 }
 0x18c   :  { %934 = vmatprep.subr.bf16.mxu1 %v1010_v1 }
 0x18f   :  { %936 = vmatpush3.bf16.msra.mxu1 %v935_v53 }
 0x190   :  { %937 = vmatprep.subr.bf16.mxu1 %v1010_v1 }
 0x193   :  { %939 = vmatpush3.bf16.msra.mxu1 %v938_v56 }
 0x194   :  { %940 = vmatprep.subr.bf16.mxu1 %v1010_v1 }
 0x197   :  { %942 = vmatpush3.bf16.msra.mxu1 %v941_v59 }
 0x198   :  { %943 = vmatprep.subr.bf16.mxu1 %v1010_v1 }
 0x19b   :  { %945 = vmatpush3.bf16.msra.mxu1 %v944_v3 }
 0x251   :  { %v278_v61 = vpop.f32.mrb[0].mxu1 }
 0x252   :  { %v279_v62 = vadd.f32 %v583_v60, %v278_v61  ;;  %v744_v63 = vpop.f32.mrb[1].mxu1 }
 0x254   :  { %778 = vmatmul.mubr.f32.vlgmr.msra.gmra.mrb[2].mxu0 %v279_v62 }
 0x255   :  { %847 = vmatprep.mubr.msk.f32.mxu0 %vm1012_vm0, %v1013_v19  ;;  %948 = vmatpush3.bf16.msra.mxu0 %v947_v7  ;;  %v481_v19 = vld [vmem:[#allocation2 + $0x230] sm:$0xff] }
 0x256   :  { %949 = vmatprep.subr.bf16.mxu0 %v1010_v1  ;;  %v956_v14 = vpack.c.bf16 %v482_v13, %v481_v19 }
 0x259   :  { %951 = vmatpush3.bf16.msra.mxu0 %v950_v9 }
 0x25a   :  { %952 = vmatprep.subr.bf16.mxu0 %v1010_v1 }
 0x25d   :  { %954 = vmatpush3.bf16.msra.mxu0 %v953_v12 }
 0x25e   :  { %955 = vmatprep.subr.bf16.mxu0 %v1010_v1 }
 0x261   :  { %957 = vmatpush3.bf16.msra.mxu0 %v956_v14 }
 0x262   :  { %958 = vmatprep.subr.bf16.mxu0 %v1010_v1 }
 0x265   :  { %960 = vmatpush3.bf16.msra.mxu0 %v959_v17 }
 0x266   :  { %961 = vmatprep.subr.bf16.mxu0 %v1010_v1 }
 0x269   :  { %963 = vmatpush3.bf16.msra.mxu0 %v962_v21 }
 0x26a   :  { %964 = vmatprep.subr.bf16.mxu0 %v1010_v1 }
 0x26d   :  { %966 = vmatpush3.bf16.msra.mxu0 %v965_v24 }
 0x26e   :  { %967 = vmatprep.subr.bf16.mxu0 %v1010_v1 }
 0x271   :  { %969 = vmatpush3.bf16.msra.mxu0 %v968_v32 }
 0x327   :  { %v373_v26 = vpop.f32.mrb[2].mxu0 }
 0x328   :  { %v374_v27 = vadd.f32 %v585_v25, %v373_v26  ;;  %v779_v28 = vpop.f32.mrb[3].mxu0 }
 0x32a   :  { %v377_v29 = vmax.f32 %v374_v27, 0.0 }
 0x32c   :  { %813 = vmatmul.mubr.f32.vlgmr.msra.gmra.mrb[2].mxu1 %v377_v29 }
 0x3ff   :  { %v469_v34 = vpop.f32.mrb[2].mxu1 }
 0x400   :  { %v470_v35 = vadd.f32 %v587_v33, %v469_v34  ;;  %v814_v1 = vpop.f32.mrb[3].mxu1 }
 0x402   :  { %v473_v36 = vmax.f32 %v470_v35, 0.0 }
 0x404   :  { %848 = vmatmul.mubr.f32.vlgmr.msra.gmra.mrb[4].mxu0 %v473_v36 }
 0x4d7   :  { %v565_v38 = vpop.f32.mrb[4].mxu0 }
 0x4d8   :  { %v566_v39 = vadd.f32 %v589_v37, %v565_v38  ;;  %v849_v40 = vpop.f32.mrb[5].mxu0 }
 0x4da   :  { %570 = vst.msk [vmem:[%s1156_s6] sm:$0xff] %vm569_vm1, %v566_v39 }
 0x4db   :  { %575 = vsyncpa [#allocation3], 1 }

</bundles_post_ra>
